<compile_context>
chip_gen: v7x
topology: tpu7x:2x2x1
jax: 0.10.0
libtpu: 0.0.40
codegen_flags: <defaults>
</compile_context>

<pallas_src>
import functools

import jax
import jax.numpy as jnp
import numpy as np
from jax.experimental import pallas as pl
from jax.experimental.pallas import tpu as pltpu

# ---------------- config (small, consistent with the module) ----------------
BATCH = 2
SEQ = 8            # num_tokens
EMB = 32           # embd_dim
EPS = 1e-5
DTYPE = jnp.float32

SUBLANE = 8
LANE = 128

# Tiling / VMEM policy (generation-safe):
#  - total in+out double-buffer footprint (4 * tile_bytes) kept under this
#    budget so tiles fit v7x's 64 MiB physical VMEM with headroom.
_TILE_BYTE_BUDGET = 24 << 20       # 24 MiB for 2x input + 2x output buffers
_VMEM_LIMIT_BYTES = 32 << 20       # above v5e's 16 MiB default, safe on v7x
_SINGLE_BLOCK_BYTES = 1 << 20      # below this: grid=(1,), no per-step overhead


def _ceil_to(a: int, b: int) -> int:
    return ((a + b - 1) // b) * b


# ------------------------------- Pallas kernel -------------------------------
def rmsnorm_kernel(x_ref, w_ref, o_ref, *, eps):
    # x_ref: (row_tile, emb) in the model's dtype; w_ref: (1, emb) f32.
    x = x_ref[...].astype(jnp.float32)          # upcast only inside the kernel
    w = w_ref[...]                              # already f32 (gamma)

    # mean(x^2) over the true feature dim.
    ssq = jnp.sum(x * x, axis=-1, keepdims=True)
    means = ssq * (1.0 / float(x.shape[-1]))
    x_norm = x * jax.lax.rsqrt(means + eps)     # rsqrt -> EUP slot
    # Rows in an out-of-bounds tail block may hold garbage, but their writes
    # are masked off by Pallas and each row's reduction is independent, so no
    # bad values leak into valid output rows.
    o_ref[...] = (x_norm * w).astype(o_ref.dtype)


# ------------------------------- wrapper -------------------------------------
def rmsnorm(x, weight, *, eps=EPS):
    """RMSNorm over the last dim of x (any leading dims), weight shape (emb,)."""
    orig_shape = x.shape
    emb = int(orig_shape[-1])
    rows = 1
    for d in orig_shape[:-1]:
        rows *= int(d)

    itemsize = jnp.dtype(x.dtype).itemsize
    x2 = x.reshape(rows, emb)                      # no padding, no extra copies
    w2 = weight.reshape(1, emb).astype(jnp.float32)  # keep gamma in f32

    total_bytes = rows * emb * itemsize
    if total_bytes <= _SINGLE_BLOCK_BYTES or rows <= SUBLANE:
        # Tiny-input fast path: one block, zero grid-step overhead.
        # (block second-last dim == full row extent -> always legal)
        row_tile = rows
    else:
        # Budget-driven row tile: as large as the VMEM budget allows.
        row_tile = _TILE_BYTE_BUDGET // (4 * emb * itemsize)
        row_tile = max(SUBLANE, (row_tile // SUBLANE) * SUBLANE)
        row_tile = min(row_tile, _ceil_to(rows, SUBLANE))
        nblocks = pl.cdiv(rows, row_tile)
        # Prefer an even number of >=2 blocks so dual-TC chips (v7x) can split
        # the "parallel" row axis evenly across TensorCores.
        if nblocks == 1:
            nblocks = 2
        if nblocks % 2 == 1:
            nblocks += 1
        row_tile = max(SUBLANE, _ceil_to(pl.cdiv(rows, nblocks), SUBLANE))

    grid = (pl.cdiv(rows, row_tile),)

    cost = pl.CostEstimate(
        flops=4 * rows * emb,                 # mul, add (reduce), mul, mul
        transcendentals=rows,                 # one rsqrt per row
        bytes_accessed=2 * rows * emb * itemsize + emb * 4,
    )

    kernel = functools.partial(rmsnorm_kernel, eps=eps)
    out = pl.pallas_call(
        kernel,
        out_shape=jax.ShapeDtypeStruct((rows, emb), x.dtype),
        grid=grid,
        in_specs=[
            pl.BlockSpec((row_tile, emb), lambda i: (i, 0)),   # x rows
            pl.BlockSpec((1, emb), lambda i: (0, 0)),          # f32 weight
        ],
        out_specs=pl.BlockSpec((row_tile, emb), lambda i: (i, 0)),
        compiler_params=pltpu.CompilerParams(
            dimension_semantics=("parallel",),
            vmem_limit_bytes=_VMEM_LIMIT_BYTES,
        ),
        cost_estimate=cost,
    )(x2, w2)

    return out.reshape(orig_shape)


# ------------------------------- pure-JAX reference --------------------------
def reference_rmsnorm(x, weight, eps=EPS):
    means = jnp.mean(x.astype(jnp.float32) ** 2, axis=-1, keepdims=True)
    x_norm = x.astype(jnp.float32) * jax.lax.rsqrt(means + eps)
    return (x_norm * weight.astype(jnp.float32)).astype(x.dtype)


# ------------------------------- main -----------------------------------------
if __name__ == "__main__":
    key = jax.random.PRNGKey(0)
    kx, kw = jax.random.split(key)

    x = jax.random.normal(kx, (BATCH, SEQ, EMB), dtype=DTYPE)
    # PyTorch init is ones; use deterministic near-one values to exercise the
    # weight multiply.
    weight = 1.0 + 0.1 * jax.random.normal(kw, (EMB,), dtype=jnp.float32)

    out = rmsnorm(x, weight)
    out = jax.block_until_ready(out)

    ref = reference_rmsnorm(x, weight)
    np.testing.assert_allclose(np.asarray(out), np.asarray(ref), rtol=1e-5, atol=1e-5)

    print("KERNEL_OK")
</pallas_src>

<mosaic_0001>
module attributes {stable_mosaic.version = 11 : i64} {
  func.func @rmsnorm_kernel(%arg0: i32, %arg1: memref<16x32xf32, #tpu.memory_space<vmem>>, %arg2: memref<1x32xf32, #tpu.memory_space<vmem>>, %arg3: memref<16x32xf32, #tpu.memory_space<vmem>>) attributes {dimension_semantics = [#tpu.dimension_semantics<parallel>], iteration_bounds = array<i64: 1>, scalar_prefetch = 0 : i64, scratch_operands = 0 : i64, tpu.core_type = #tpu.core_type<tc>, window_params = [{transform_indices = @transform_0, window_bounds = array<i64: 16, 32>}, {pipeline_mode = #tpu.pipeline_mode<synchronous>, transform_indices = @transform_1, window_bounds = array<i64: 1, 32>}, {transform_indices = @transform_2, window_bounds = array<i64: 16, 32>}]} {
    %c0 = arith.constant 0 : index
    %c0_0 = arith.constant 0 : index
    %0 = vector.load %arg1[%c0, %c0_0] : memref<16x32xf32, #tpu.memory_space<vmem>>, vector<16x32xf32>
    %c0_1 = arith.constant 0 : index
    %c0_2 = arith.constant 0 : index
    %1 = vector.load %arg2[%c0_1, %c0_2] : memref<1x32xf32, #tpu.memory_space<vmem>>, vector<1x32xf32>
    %2 = arith.mulf %0, %0 : vector<16x32xf32>
    %cst = arith.constant dense<0.000000e+00> : vector<16xf32>
    %3 = vector.multi_reduction <add>, %2, %cst [1] : vector<16x32xf32> to vector<16xf32>
    %4 = vector.shape_cast %3 : vector<16xf32> to vector<16x1xf32>
    %cst_3 = arith.constant 3.125000e-02 : f32
    %5 = vector.broadcast %cst_3 : f32 to vector<16x1xf32>
    %6 = arith.mulf %4, %5 : vector<16x1xf32>
    %cst_4 = arith.constant 9.99999974E-6 : f32
    %7 = vector.broadcast %cst_4 : f32 to vector<16x1xf32>
    %8 = arith.addf %6, %7 : vector<16x1xf32>
    %9 = math.rsqrt %8 : vector<16x1xf32>
    %10 = vector.broadcast %9 : vector<16x1xf32> to vector<16x32xf32>
    %11 = arith.mulf %0, %10 : vector<16x32xf32>
    %12 = vector.broadcast %1 : vector<1x32xf32> to vector<16x32xf32>
    %13 = arith.mulf %11, %12 : vector<16x32xf32>
    %c0_5 = arith.constant 0 : index
    %c0_6 = arith.constant 0 : index
    %14 = vector.load %arg3[%c0_5, %c0_6] : memref<16x32xf32, #tpu.memory_space<vmem>>, vector<16x32xf32>
    tpu.vector_store %arg3[%c0_5, %c0_6], %13 {strides = array<i32>} : memref<16x32xf32, #tpu.memory_space<vmem>>, vector<16x32xf32>,
    return
  }
  func.func @transform_0(%arg0: i32) -> (i32, i32) {
    %c0_i32 = arith.constant 0 : i32
    %c0_i32_0 = arith.constant 0 : i32
    return %arg0, %c0_i32 : i32, i32
  }
  func.func @transform_1(%arg0: i32) -> (i32, i32) {
    %c0_i32 = arith.constant 0 : i32
    %c0_i32_0 = arith.constant 0 : i32
    %c0_i32_1 = arith.constant 0 : i32
    return %c0_i32, %c0_i32_0 : i32, i32
  }
  func.func @transform_2(%arg0: i32) -> (i32, i32) {
    %c0_i32 = arith.constant 0 : i32
    %c0_i32_0 = arith.constant 0 : i32
    return %arg0, %c0_i32 : i32, i32
  }
}

</mosaic_0001>

<bundles_post_ra>
// kernel: tpu_custom_call.1
= control target key start
LH: loop header
LB: loop body
LE: loop exit
PB: predicated region body
PF: predicated region fallthrough
CT: control target
= control target key end

     0   :  { %7 = vsyncpa [#allocation3], 0  ;;  %s186_s0 = inlined_call_operand.hbm [shape: f32[16,32], index: 0, kind: input, shape index: {}]   ;;  %s187_s1 = inlined_call_operand.vmem [shape: f32[1,32], index: 1, kind: input, shape index: {}]   ;;  %s188_s2 = inlined_call_operand.hbm [shape: f32[16,32], index: 2, kind: output, shape index: {}]  }
   0x1   :  { %8 = vsyncpa [#allocation4], 0  ;;  %s130_s9 = smov [#allocation2]   ;;  %s82_s13 = scalar_lea.hbm %s186_s0, 256 }
   0x2   :  { %s14_s10 = sshll.u32 %s130_s9, 4  ;;  %p83_p0 = scmp.ne.s32.totalorder %s186_s0, %s82_s13  ;;  %s15_s10 = int_to_ptr.vmem [resolvable:$true] %s14_s10 }
   0x3   :  { %p86_p1 = scmp.lt.u32.totalorder %s82_s13, %s186_s0 }
   0x5   :  { %p88_p2 = pnand %p86_p1, %p83_p0 }
   0x7   :  { %91 = shalt.err (!%p88_p2)
}
   0x8   :  { %s92_s18 = scalar_lea.vmem %s15_s10, 256  ;;  %p97_p4 = scmp.lt.s32.totalorder %s15_s10, %s15_s10 }
   0x9   :  { %p93_p3 = scmp.ne.s32.totalorder %s15_s10, %s92_s18  ;;  %p98_p5 = scmp.lt.s32.totalorder %s92_s18, %s92_s18 }
   0xb   :  { %p99_p6 = por %p98_p5, %p97_p4 }
   0xd   :  { %p100_p7 = pnand %p99_p6, %p93_p3 }
   0xf   :  { %103 = shalt.err (!%p100_p7)
}
  0x10   :  { %s131_s19 = smov 128   ;;  %s132_s20 = smov 8  }
  0x11   :  { %20 = dma.hbm_to_vmem [thread:$0]  %s186_s0, 256, %s15_s10, [#allocation3], %s131_s19, %s131_s19, %s132_s20  }
  0x12   :  { %126 = dma.done.wait [#allocation3], 256  }
  0x13   :  { %127 = vsyncadd [#allocation3], 4294967040  ;;  %v26_v0 = vld [vmem:[#allocation2] sm:$0xff]  ;;  %vm31_vm0 = vcmask 261120   ;;  %v27_v1 = vld [vmem:[#allocation2 + $0x8] sm:$0xff]  ;;  %s133_s24 = smov [#allocation5]  }
  0x14   :  { %v29_v2 = vmul.f32 %v26_v0, %v26_v0  ;;  %v30_v3 = vmul.f32 %v27_v1, %v27_v1  ;;  %v73_v13 = vld [vmem:[%s187_s1] ss:$0 sm:$0xff]  ;;  %s61_s25 = sshll.u32 %s133_s24, 4  ;;  %s62_s25 = int_to_ptr.vmem [resolvable:$true] %s61_s25 }
  0x15   :  { %s104_s26 = scalar_lea.vmem %s62_s25, 256  ;;  %p109_p9 = scmp.lt.s32.totalorder %s62_s25, %s62_s25 }
  0x16   :  { %v32_v4 = vsel %vm31_vm0, %v29_v2, 0.0  ;;  %v35_v5 = vsel %vm31_vm0, %v30_v3, 0.0  ;;  %p105_p8 = scmp.ne.s32.totalorder %s62_s25, %s104_s26  ;;  %p110_p10 = scmp.lt.s32.totalorder %s104_s26, %s104_s26 }
  0x17   :  { %33 = vadd.xlane.f32.xlu0 %v32_v4 }
  0x18   :  { %p111_p11 = por %p110_p10, %p109_p9 }
  0x1a   :  { %p112_p12 = pnand %p111_p11, %p105_p8 }
  0x1b   :  { %36 = vadd.xlane.f32.xlu0 %v35_v5 }
  0xa4   :  { %v34_v6 = vpop.xlane.xlu0 %33 }
  0xa5   :  { %v38_v7 = vmul.f32 0.03125, %v34_v6 }
  0xa7   :  { %v40_v8 = vadd.f32 1e-05, %v38_v7 }
  0xa8   :  { %v37_v9 = vpop.xlane.xlu0 %36 }
  0xa9   :  { %78 = vrsqrt.f32 %v40_v8  ;;  %v39_v10 = vmul.f32 0.03125, %v37_v9 }
  0xab   :  { %v41_v11 = vadd.f32 1e-05, %v39_v10 }
  0xad   :  { %80 = vrsqrt.f32 %v41_v11 }
  0xb3   :  { %v79_v12 = vpop.eup %78 }
  0xb4   :  { %v44_v14 = vmul.f32 %v79_v12, %v26_v0 }
  0xb6   :  { %v52_v15 = vmul.f32 %v73_v13, %v44_v14 }
  0xb7   :  { %v81_v16 = vpop.eup %80 }
  0xb8   :  { %v45_v17 = vmul.f32 %v81_v16, %v27_v1  ;;  %54 = vst.msk [vmem:[#allocation5] sm:$0xff] %vm31_vm0, %v52_v15 }
  0xba   :  { %v53_v18 = vmul.f32 %v73_v13, %v45_v17 }
  0xbc   :  { %55 = vst.msk [vmem:[#allocation5 + $0x8] sm:$0xff] %vm31_vm0, %v53_v18 }
  0xbd   :  { %115 = shalt.err (!%p112_p12)
}
  0xbe   :  { %s116_s28 = scalar_lea.hbm %s188_s2, 256 }
  0xbf   :  { %p117_p13 = scmp.ne.s32.totalorder %s188_s2, %s116_s28  ;;  %p120_p0 = scmp.lt.u32.totalorder %s116_s28, %s188_s2 }
  0xc1   :  { %p122_p1 = pnand %p120_p0, %p117_p13 }
  0xc3   :  { %125 = shalt.err (!%p122_p1)
}
  0xc4   :  { %67 = dma.vmem_to_hbm [thread:$0]  %s62_s25, 256, %s188_s2, [#allocation4], %s131_s19, %s131_s19, %s132_s20  }
  0xc5   :  { %128 = dma.done.wait [#allocation4], 256  }
  0xc6   :  { %129 = vsyncadd [#allocation4], 4294967040 }
  0xc7   :  { %71 = vsyncpa [#allocation3], 1 }
  0xc8   :  { %72 = vsyncpa [#allocation4], 1 }

</bundles_post_ra>
